<compile_context>
chip_gen: v5e
topology: v5e:2x2
jax: 0.10.0
libtpu: 0.0.40
codegen_flags: <defaults>
</compile_context>

<pallas_src>
import jax
import jax.numpy as jnp
from jax.experimental import pallas as pl
from jax.experimental.pallas import tpu as pltpu


# ----------------------------------------------------------------------------- kernel
def _lightsb_fwd_kernel(xT_ref, ws_ref, wr_ref, la_ref, pT_ref, gT_ref, zT_ref, outT_ref):
    xT = xT_ref[...]                                 # (D, tb)  f32, lanes = batch
    gT = gT_ref[...].astype(jnp.float32)             # (K, tb)  Gumbel noise (bf16 -> f32)
    zT = zT_ref[...].astype(jnp.float32)             # (D, tb)  Normal noise (bf16 -> f32)

    D = xT.shape[0]
    K = gT.shape[0]

    # Mixture logits (transposed, (K, tb)).  Two MXU pushes, no feats concatenate.
    logits = jnp.dot(ws_ref[...], xT * xT, preferred_element_type=jnp.float32)
    logits = logits + jnp.dot(wr_ref[...], xT, preferred_element_type=jnp.float32)
    logits = logits + la_ref[...]                    # (K, 1) lane-broadcast

    # Categorical draw via Gumbel-max over the small K sublane axis.
    scores = logits + gT
    best = jnp.max(scores, axis=0, keepdims=True)                     # (1, tb)
    sub = jax.lax.broadcasted_iota(jnp.int32, scores.shape, 0)        # (K, tb)
    # first-match tie-break -> exactly one 1 per column even on exact ties
    idx = jnp.min(jnp.where(scores == best, sub, K), axis=0, keepdims=True)
    onehot = (sub == idx).astype(jnp.float32)                         # (K, tb)

    # One fused one-hot gather of (S_k ; r_k ; sqrt(eps*S_k)) -> (3D, tb).
    sel = jnp.dot(pT_ref[...], onehot, preferred_element_type=jnp.float32)
    Sk = sel[0:D, :]
    rk = sel[D:2 * D, :]
    sq = sel[2 * D:3 * D, :]

    # Reparameterized Gaussian sample; lane-dense (unmasked) store.
    outT_ref[...] = rk + Sk * xT + sq * zT


# ----------------------------------------------------------------------------- tiling
def _choose_tile(B, block_batch):
    """Pick (tb, B_padded): lane-tile width (multiple of 128 when possible) and the
    padded batch it divides.  No forced multi-step split: single-TC chips (v5e/v6e)
    prefer one big step at small B; on v7x megacore sharding kicks in automatically
    once B > block_batch (>= 2 grid steps)."""
    if B <= 128:
        return B, B                                  # tiny batch: one full-extent tile
    cap = max(128, (min(block_batch, B) // 128) * 128)
    Bp = ((B + 127) // 128) * 128                    # pad batch up to a lane multiple
    tb = cap
    while Bp % tb != 0:                              # largest 128-multiple divisor <= cap
        tb -= 128
    if tb < min(cap, 1024):                          # awkward divisor structure: pad more
        n = -(-B // cap)                             # number of steps at the cap
        tb = -(-B // (n * 128)) * 128                # near-even 128-aligned split
        Bp = n * tb
    return tb, Bp


# ----------------------------------------------------------------------------- wrappers
def lightsb_forward_t(xT, log_S, r, log_alpha, gumbelT, normalT, *,
                      epsilon=1.0, block_batch=16384):
    """Performance-native entry point.  All arrays are batch-last (lane-dense):
       xT (D, B) float32, gumbelT (K, B), normalT (D, B) (bf16 preferred, any float ok).
       Returns samples^T of shape (D, B) float32.  No layout passes outside the kernel."""
    D, B = xT.shape
    K = r.shape[0]
    eps = float(epsilon)
    block_batch = int(min(max(block_batch, 128), 32768))   # VMEM-safe on v7x (64 MiB)

    xT = xT.astype(jnp.float32)

    # Parameter fusion / pre-scaling: done once, outside the grid loop.
    S = jnp.exp(log_S).astype(jnp.float32)                                  # (K, D)
    WS = S * (1.0 / (2.0 * eps))                                            # (K, D)
    WR = r.astype(jnp.float32) * (1.0 / eps)                                # (K, D)
    PT = jnp.concatenate([S, r.astype(jnp.float32), jnp.sqrt(eps * S)],
                         axis=1).T                                          # (3D, K)
    la = log_alpha.reshape(K, 1).astype(jnp.float32)                        # (K, 1)

    tb, Bp = _choose_tile(B, block_batch)
    if Bp != B:
        pad = Bp - B
        xT = jnp.pad(xT, ((0, 0), (0, pad)))
        gumbelT = jnp.pad(gumbelT, ((0, 0), (0, pad)))
        normalT = jnp.pad(normalT, ((0, 0), (0, pad)))
    n_iter = Bp // tb

    bytes_accessed = int(
        Bp * (4 * D                                   # x^T read
              + gumbelT.dtype.itemsize * K            # gumbel read
              + normalT.dtype.itemsize * D            # normal read
              + 4 * D)                                # output write
        + 4 * (WS.size + WR.size + PT.size + la.size))
    cost = pl.CostEstimate(flops=int(10 * D * K * Bp + 8 * D * Bp),
                           transcendentals=0,
                           bytes_accessed=bytes_accessed)

    outT = pl.pallas_call(
        _lightsb_fwd_kernel,
        out_shape=jax.ShapeDtypeStruct((D, Bp), jnp.float32),
        grid_spec=pltpu.PrefetchScalarGridSpec(
            num_scalar_prefetch=0,
            grid=(n_iter,),
            in_specs=[
                pl.BlockSpec((D, tb), lambda i: (0, i)),       # x^T sub-batch
                pl.BlockSpec((K, D), lambda i: (0, 0)),        # W_S = S/(2 eps)   (resident)
                pl.BlockSpec((K, D), lambda i: (0, 0)),        # W_r = r/eps       (resident)
                pl.BlockSpec((K, 1), lambda i: (0, 0)),        # log_alpha         (resident)
                pl.BlockSpec((3 * D, K), lambda i: (0, 0)),    # [S ; r ; sqrt]^T  (resident)
                pl.BlockSpec((K, tb), lambda i: (0, i)),       # Gumbel noise
                pl.BlockSpec((D, tb), lambda i: (0, i)),       # Normal noise
            ],
            out_specs=pl.BlockSpec((D, tb), lambda i: (0, i)),
        ),
        compiler_params=pltpu.CompilerParams(
            dimension_semantics=("parallel",),
            vmem_limit_bytes=64 * 1024 * 1024),
        cost_estimate=cost,
    )(xT, WS, WR, la, PT, gumbelT, normalT)

    if Bp != B:
        outT = outT[:, :B]
    return outT


def lightsb_sample(xT, log_S, r, log_alpha, key, *, epsilon=1.0, block_batch=16384):
    """Mirrors LightSBplus.forward: draws the mixture noise internally, directly in the
    transposed bf16 layout (no HLO transposes, half-width noise stream)."""
    D, B = xT.shape
    K = r.shape[0]
    kg, kn = jax.random.split(key)
    gumbelT = jax.random.gumbel(kg, (K, B), jnp.float32).astype(jnp.bfloat16)
    normalT = jax.random.normal(kn, (D, B), jnp.float32).astype(jnp.bfloat16)
    return lightsb_forward_t(xT, log_S, r, log_alpha, gumbelT, normalT,
                             epsilon=epsilon, block_batch=block_batch)


def lightsb_forward(x, log_S, r, log_alpha, gumbel, normal, *, epsilon=1.0, block_batch=16384):
    """(B, D)-layout convenience wrapper (matches the PyTorch forward signature with
    explicit noise).  NOTE: the transposes here cost two extra HBM passes over x/out;
    prefer lightsb_forward_t / lightsb_sample with batch-last data."""
    outT = lightsb_forward_t(x.T, log_S, r, log_alpha, gumbel.T, normal.T,
                             epsilon=epsilon, block_batch=block_batch)
    return outT.T


# ----------------------------------------------------------------------------- reference
def lightsb_forward_ref_t(xT, log_S, r, log_alpha, gumbelT, normalT, *, epsilon=1.0):
    """Pure-JAX reference consuming the same (transposed, possibly bf16) noise."""
    x = xT.T.astype(jnp.float32)
    g = gumbelT.T.astype(jnp.float32)
    z = normalT.T.astype(jnp.float32)
    S = jnp.exp(log_S)
    logits = (x * x) @ S.T / (2.0 * epsilon) + (x @ r.T) / epsilon + log_alpha[None, :]
    idx = jnp.argmax(logits + g, axis=-1)
    out = r[idx] + S[idx] * x + jnp.sqrt(epsilon * S[idx]) * z
    return out.T


def _verify(outT, xT, log_S, r, log_alpha, gumbelT, normalT, epsilon):
    out = outT.T
    x = xT.T.astype(jnp.float32)
    g = gumbelT.T.astype(jnp.float32)
    z = normalT.T.astype(jnp.float32)
    S = jnp.exp(log_S)
    logits = (x * x) @ S.T / (2.0 * epsilon) + (x @ r.T) / epsilon + log_alpha[None, :]
    scores = logits + g                                                    # (B, K)
    # Every output row must equal the sample of SOME component k ...
    cand = (r[None, :, :] + S[None, :, :] * x[:, None, :]
            + jnp.sqrt(epsilon * S)[None, :, :] * z[:, None, :])           # (B, K, D)
    row_match = jnp.all(jnp.abs(cand - out[:, None, :]) <= 1e-5, axis=-1)  # (B, K)
    assert bool(jnp.all(jnp.any(row_match, axis=-1))), \
        "kernel output is not a valid mixture-component sample"
    # ... and that component must be the (near-)argmax of the Gumbel-max scores
    # (tolerance covers MXU-vs-XLA rounding of the logits on near-ties).
    sel_score = jnp.max(jnp.where(row_match, scores, -jnp.inf), axis=-1)
    assert bool(jnp.all(sel_score >= jnp.max(scores, axis=-1) - 1e-4)), \
        "selected component is not the (near-)argmax"
    # Exact match against the pure-JAX reference on (essentially) all rows.
    refT = lightsb_forward_ref_t(xT, log_S, r, log_alpha, gumbelT, normalT, epsilon=epsilon)
    exact_cols = jnp.all(jnp.abs(outT - refT) <= 1e-5, axis=0)
    assert float(jnp.mean(exact_cols.astype(jnp.float32))) > 0.98


# ----------------------------------------------------------------------------- demo / test
if __name__ == "__main__":
    # Module hyper-parameters (small, consistent with LightSBplus.__init__/forward).
    dim = 16
    n_potentials = 8
    epsilon = 1.0
    batch = 1024
    S_diagonal_init = 0.1

    key = jax.random.PRNGKey(0)
    k_r, k_x, k_g, k_n, k_s, k_x3, k_g3, k_n3 = jax.random.split(key, 8)

    # Deterministic parameter init (mirrors __init__).
    log_alpha = jnp.log(jnp.ones((n_potentials,), jnp.float32) / n_potentials)
    r = jax.random.normal(k_r, (n_potentials, dim), jnp.float32)
    log_S = jnp.log(S_diagonal_init * jnp.ones((n_potentials, dim), jnp.float32))

    # Batch-last ("transposed") data: the performance-native layout.  The noise is
    # generated directly in this layout (i.i.d. -> free) and streamed as bf16.
    xT = jax.random.normal(k_x, (dim, batch), jnp.float32)
    gumbelT = jax.random.gumbel(k_g, (n_potentials, batch), jnp.float32).astype(jnp.bfloat16)
    normalT = jax.random.normal(k_n, (dim, batch), jnp.float32).astype(jnp.bfloat16)

    # 1) default tiling (single big lane-dense tile at this small batch)
    outT = jax.block_until_ready(
        lightsb_forward_t(xT, log_S, r, log_alpha, gumbelT, normalT, epsilon=epsilon))
    assert outT.shape == (dim, batch) and outT.dtype == jnp.float32
    _verify(outT, xT, log_S, r, log_alpha, gumbelT, normalT, epsilon)

    # 2) small tile -> exercises the multi-step pipelined grid path
    outT2 = jax.block_until_ready(
        lightsb_forward_t(xT, log_S, r, log_alpha, gumbelT, normalT,
                          epsilon=epsilon, block_batch=256))
    _verify(outT2, xT, log_S, r, log_alpha, gumbelT, normalT, epsilon)

    # 3) (B, D) convenience wrapper on a non-128-divisible batch (pad + slice path)
    b3 = 200
    x3 = jax.random.normal(k_x3, (b3, dim), jnp.float32)
    g3 = jax.random.gumbel(k_g3, (b3, n_potentials), jnp.float32)
    n3 = jax.random.normal(k_n3, (b3, dim), jnp.float32)
    out3 = jax.block_until_ready(
        lightsb_forward(x3, log_S, r, log_alpha, g3, n3, epsilon=epsilon, block_batch=128))
    assert out3.shape == (b3, dim)
    _verify(out3.T, x3.T, log_S, r, log_alpha, g3.T, n3.T, epsilon)

    # 4) production sampling path (noise drawn internally, mirrors torch forward)
    outS = jax.block_until_ready(
        lightsb_sample(xT, log_S, r, log_alpha, k_s, epsilon=epsilon))
    assert outS.shape == (dim, batch) and bool(jnp.all(jnp.isfinite(outS)))
    S = jnp.exp(log_S)
    x = xT.T
    z_rec = (outS.T[:, None, :] - r[None, :, :] - S[None, :, :] * x[:, None, :]) \
        / jnp.sqrt(epsilon * S)[None, :, :]                                  # (B, K, D)
    # every column must be a plausible reparameterized sample of SOME component
    assert bool(jnp.all(jnp.any(jnp.max(jnp.abs(z_rec), axis=-1) < 8.0, axis=-1)))

    print("KERNEL_OK")
</pallas_src>

<mosaic_0001>
module attributes {stable_mosaic.version = 11 : i64} {
  func.func @_lightsb_fwd_kernel(%arg0: i32, %arg1: memref<16x1024xf32, #tpu.memory_space<vmem>>, %arg2: memref<8x16xf32, #tpu.memory_space<vmem>>, %arg3: memref<8x16xf32, #tpu.memory_space<vmem>>, %arg4: memref<8x1xf32, #tpu.memory_space<vmem>>, %arg5: memref<48x8xf32, #tpu.memory_space<vmem>>, %arg6: memref<8x1024xbf16, #tpu.memory_space<vmem>>, %arg7: memref<16x1024xbf16, #tpu.memory_space<vmem>>, %arg8: memref<16x1024xf32, #tpu.memory_space<vmem>>) attributes {dimension_semantics = [#tpu.dimension_semantics<parallel>], iteration_bounds = array<i64: 1>, scalar_prefetch = 0 : i64, scratch_operands = 0 : i64, tpu.core_type = #tpu.core_type<tc>, window_params = [{transform_indices = @transform_0, window_bounds = array<i64: 16, 1024>}, {pipeline_mode = #tpu.pipeline_mode<synchronous>, transform_indices = @transform_1, window_bounds = array<i64: 8, 16>}, {pipeline_mode = #tpu.pipeline_mode<synchronous>, transform_indices = @transform_2, window_bounds = array<i64: 8, 16>}, {pipeline_mode = #tpu.pipeline_mode<synchronous>, transform_indices = @transform_3, window_bounds = array<i64: 8, 1>}, {pipeline_mode = #tpu.pipeline_mode<synchronous>, transform_indices = @transform_4, window_bounds = array<i64: 48, 8>}, {transform_indices = @transform_5, window_bounds = array<i64: 8, 1024>}, {transform_indices = @transform_6, window_bounds = array<i64: 16, 1024>}, {transform_indices = @transform_7, window_bounds = array<i64: 16, 1024>}]} {
    %c0 = arith.constant 0 : index
    %c0_0 = arith.constant 0 : index
    %0 = vector.load %arg1[%c0, %c0_0] : memref<16x1024xf32, #tpu.memory_space<vmem>>, vector<16x1024xf32>
    %c0_1 = arith.constant 0 : index
    %c0_2 = arith.constant 0 : index
    %1 = vector.load %arg6[%c0_1, %c0_2] : memref<8x1024xbf16, #tpu.memory_space<vmem>>, vector<8x1024xbf16>
    %2 = arith.extf %1 : vector<8x1024xbf16> to vector<8x1024xf32>
    %c0_3 = arith.constant 0 : index
    %c0_4 = arith.constant 0 : index
    %3 = vector.load %arg7[%c0_3, %c0_4] : memref<16x1024xbf16, #tpu.memory_space<vmem>>, vector<16x1024xbf16>
    %4 = arith.extf %3 : vector<16x1024xbf16> to vector<16x1024xf32>
    %c0_5 = arith.constant 0 : index
    %c0_6 = arith.constant 0 : index
    %5 = vector.load %arg2[%c0_5, %c0_6] : memref<8x16xf32, #tpu.memory_space<vmem>>, vector<8x16xf32>
    %6 = arith.mulf %0, %0 : vector<16x1024xf32>
    %cst = arith.constant dense<0.000000e+00> : vector<8x1024xf32>
    %7 = tpu.matmul %5, %6, %cst {dimension_numbers = #tpu.dot_dimension_numbers<[1], [0], [0], [1], [0, 0, 1, 1], [], []>} : vector<8x16xf32>, vector<16x1024xf32>, vector<8x1024xf32> -> vector<8x1024xf32>
    %c0_7 = arith.constant 0 : index
    %c0_8 = arith.constant 0 : index
    %8 = vector.load %arg3[%c0_7, %c0_8] : memref<8x16xf32, #tpu.memory_space<vmem>>, vector<8x16xf32>
    %cst_9 = arith.constant dense<0.000000e+00> : vector<8x1024xf32>
    %9 = tpu.matmul %8, %0, %cst_9 {dimension_numbers = #tpu.dot_dimension_numbers<[1], [0], [0], [1], [0, 0, 1, 1], [], []>} : vector<8x16xf32>, vector<16x1024xf32>, vector<8x1024xf32> -> vector<8x1024xf32>
    %10 = arith.addf %7, %9 : vector<8x1024xf32>
    %c0_10 = arith.constant 0 : index
    %c0_11 = arith.constant 0 : index
    %11 = vector.load %arg4[%c0_10, %c0_11] : memref<8x1xf32, #tpu.memory_space<vmem>>, vector<8x1xf32>
    %12 = vector.broadcast %11 : vector<8x1xf32> to vector<8x1024xf32>
    %13 = arith.addf %10, %12 : vector<8x1024xf32>
    %14 = arith.addf %13, %2 : vector<8x1024xf32>
    %cst_12 = arith.constant dense<0xFF800000> : vector<1024xf32>
    %15 = vector.multi_reduction <maximumf>, %14, %cst_12 [0] : vector<8x1024xf32> to vector<1024xf32>
    %16 = vector.shape_cast %15 : vector<1024xf32> to vector<1x1024xf32>
    %17 = tpu.iota {dimensions = array<i32: 0>} : vector<8x1024xi32>
    %18 = vector.broadcast %16 : vector<1x1024xf32> to vector<8x1024xf32>
    %19 = arith.cmpf oeq, %14, %18 : vector<8x1024xf32>
    %c8_i32 = arith.constant 8 : i32
    %20 = vector.broadcast %c8_i32 : i32 to vector<8x1024xi32>
    %21 = arith.select %19, %17, %20 : vector<8x1024xi1>, vector<8x1024xi32>
    %cst_13 = arith.constant dense<2147483647> : vector<1024xi32>
    %22 = vector.multi_reduction <minsi>, %21, %cst_13 [0] : vector<8x1024xi32> to vector<1024xi32>
    %23 = vector.shape_cast %22 : vector<1024xi32> to vector<1x1024xi32>
    %24 = vector.broadcast %23 : vector<1x1024xi32> to vector<8x1024xi32>
    %25 = arith.cmpi eq, %17, %24 : vector<8x1024xi32>
    %26 = arith.extui %25 : vector<8x1024xi1> to vector<8x1024xi32>
    %27 = arith.sitofp %26 : vector<8x1024xi32> to vector<8x1024xf32>
    %c0_14 = arith.constant 0 : index
    %c0_15 = arith.constant 0 : index
    %28 = vector.load %arg5[%c0_14, %c0_15] : memref<48x8xf32, #tpu.memory_space<vmem>>, vector<48x8xf32>
    %cst_16 = arith.constant dense<0.000000e+00> : vector<48x1024xf32>
    %29 = tpu.matmul %28, %27, %cst_16 {dimension_numbers = #tpu.dot_dimension_numbers<[1], [0], [0], [1], [0, 0, 1, 1], [], []>} : vector<48x8xf32>, vector<8x1024xf32>, vector<48x1024xf32> -> vector<48x1024xf32>
    %30 = vector.extract_strided_slice %29 {offsets = [0, 0], sizes = [16, 1024], strides = [1, 1]} : vector<48x1024xf32> to vector<16x1024xf32>
    %31 = vector.extract_strided_slice %29 {offsets = [16, 0], sizes = [16, 1024], strides = [1, 1]} : vector<48x1024xf32> to vector<16x1024xf32>
    %32 = vector.extract_strided_slice %29 {offsets = [32, 0], sizes = [16, 1024], strides = [1, 1]} : vector<48x1024xf32> to vector<16x1024xf32>
    %33 = arith.mulf %30, %0 : vector<16x1024xf32>
    %34 = arith.addf %31, %33 : vector<16x1024xf32>
    %35 = arith.mulf %32, %4 : vector<16x1024xf32>
    %36 = arith.addf %34, %35 : vector<16x1024xf32>
    %c0_17 = arith.constant 0 : index
    %c0_18 = arith.constant 0 : index
    %37 = vector.load %arg8[%c0_17, %c0_18] : memref<16x1024xf32, #tpu.memory_space<vmem>>, vector<16x1024xf32>
    tpu.vector_store %arg8[%c0_17, %c0_18], %36 {strides = array<i32>} : memref<16x1024xf32, #tpu.memory_space<vmem>>, vector<16x1024xf32>,
    return
  }
  func.func @transform_0(%arg0: i32) -> (i32, i32) {
    %c0_i32 = arith.constant 0 : i32
    %c0_i32_0 = arith.constant 0 : i32
    return %c0_i32, %arg0 : i32, i32
  }
  func.func @transform_1(%arg0: i32) -> (i32, i32) {
    %c0_i32 = arith.constant 0 : i32
    %c0_i32_0 = arith.constant 0 : i32
    %c0_i32_1 = arith.constant 0 : i32
    return %c0_i32, %c0_i32_0 : i32, i32
  }
  func.func @transform_2(%arg0: i32) -> (i32, i32) {
    %c0_i32 = arith.constant 0 : i32
    %c0_i32_0 = arith.constant 0 : i32
    %c0_i32_1 = arith.constant 0 : i32
    return %c0_i32, %c0_i32_0 : i32, i32
  }
  func.func @transform_3(%arg0: i32) -> (i32, i32) {
    %c0_i32 = arith.constant 0 : i32
    %c0_i32_0 = arith.constant 0 : i32
    %c0_i32_1 = arith.constant 0 : i32
    return %c0_i32, %c0_i32_0 : i32, i32
  }
  func.func @transform_4(%arg0: i32) -> (i32, i32) {
    %c0_i32 = arith.constant 0 : i32
    %c0_i32_0 = arith.constant 0 : i32
    %c0_i32_1 = arith.constant 0 : i32
    return %c0_i32, %c0_i32_0 : i32, i32
  }
  func.func @transform_5(%arg0: i32) -> (i32, i32) {
    %c0_i32 = arith.constant 0 : i32
    %c0_i32_0 = arith.constant 0 : i32
    return %c0_i32, %arg0 : i32, i32
  }
  func.func @transform_6(%arg0: i32) -> (i32, i32) {
    %c0_i32 = arith.constant 0 : i32
    %c0_i32_0 = arith.constant 0 : i32
    return %c0_i32, %arg0 : i32, i32
  }
  func.func @transform_7(%arg0: i32) -> (i32, i32) {
    %c0_i32 = arith.constant 0 : i32
    %c0_i32_0 = arith.constant 0 : i32
    return %c0_i32, %arg0 : i32, i32
  }
}

</mosaic_0001>

<bundles_post_ra>
// kernel: tpu_custom_call.1
= control target key start
LH: loop header
LB: loop body
LE: loop exit
PB: predicated region body
PF: predicated region fallthrough
CT: control target
= control target key end

     0   :  { %12 = vsyncpa [#allocation3], 0  ;;  %s1644_s0 = inlined_call_operand.hbm [shape: f32[16,1024], index: 0, kind: input, shape index: {}]   ;;  %s1645_s1 = inlined_call_operand.hbm [shape: f32[8,16], index: 1, kind: input, shape index: {}]   ;;  %s1646_s2 = inlined_call_operand.hbm [shape: f32[8,16], index: 2, kind: input, shape index: {}]   ;;  %s1647_s3 = inlined_call_operand.vmem [shape: f32[8,1], index: 3, kind: input, shape index: {}]   ;;  %s1648_s4 = inlined_call_operand.vmem [shape: f32[48,8], index: 4, kind: input, shape index: {}]   ;;  %s1649_s5 = inlined_call_operand.hbm [shape: bf16[8,1024], index: 5, kind: input, shape index: {}]   ;;  %s1650_s6 = inlined_call_operand.vmem [shape: bf16[16,1024], index: 6, kind: input, shape index: {}]   ;;  %s1651_s7 = inlined_call_operand.hbm [shape: f32[16,1024], index: 7, kind: output, shape index: {}]  }
   0x1   :  { %13 = vsyncpa [#allocation6], 0 }
   0x2   :  { %14 = vsyncpa [#allocation9], 0  ;;  %s34_s26 = sshll.u32 %s1645_s1, 4  ;;  %s35_s26 = int_to_ptr.hbm [resolvable:$true] %s34_s26 }
   0x3   :  { %15 = vsyncpa [#allocation4], 0  ;;  %s1289_s27 = smov [#allocation5]   ;;  %s20_s8 = sshll.u32 %s1644_s0, 4  ;;  %s21_s8 = int_to_ptr.hbm [resolvable:$true] %s20_s8 }
   0x4   :  { %s36_s28 = sshll.u32 %s1289_s27, 4  ;;  %s1290_s9 = smov [#allocation2]   ;;  %s37_s28 = int_to_ptr.vmem [resolvable:$true] %s36_s28 }
   0x5   :  { %39 = dma.hbm_to_vmem [thread:$0]  %s35_s26, 128, %s37_s28, [#allocation6]  }
   0x6   :  { %s22_s10 = sshll.u32 %s1290_s9, 4  ;;  %s1291_s11 = smov 1024   ;;  %s23_s10 = int_to_ptr.vmem [resolvable:$true] %s22_s10 }
   0x7   :  { %s1292_s12 = smov 64   ;;  %s45_s14 = sshll.u32 %s1646_s2, 4  ;;  %s46_s14 = int_to_ptr.hbm [resolvable:$true] %s45_s14 }
   0x8   :  { %28 = dma.hbm_to_vmem [thread:$0]  %s21_s8, 2048, %s23_s10, [#allocation3], %s1291_s11, %s1291_s11, %s1292_s12  }
   0x9   :  { %s1293_s15 = smov [#allocation7]   ;;  %s60_s18 = sshll.u32 %s1649_s5, 4  ;;  %s61_s18 = int_to_ptr.hbm [resolvable:$true] %s60_s18 }
   0xa   :  { %s47_s16 = sshll.u32 %s1293_s15, 4  ;;  %s1294_s19 = smov [#allocation8]   ;;  %s48_s16 = int_to_ptr.vmem [resolvable:$true] %s47_s16 }
   0xb   :  { %50 = dma.hbm_to_vmem [thread:$0]  %s46_s14, 128, %s48_s16, [#allocation6]  }
   0xc   :  { %s62_s20 = sshll.u32 %s1294_s19, 4  ;;  %s63_s20 = int_to_ptr.vmem [resolvable:$true] %s62_s20 }
   0xd   :  { %65 = dma.hbm_to_vmem [thread:$0]  %s61_s18, 512, %s63_s20, [#allocation9]  }
   0xe   :  { %1281 = dma.done.wait [#allocation3], 2048  }
   0xf   :  { %1282 = vsyncadd [#allocation3], 4294965248 }
  0x10   :  { %1283 = dma.done.wait [#allocation6], 256  }
  0x11   :  { %1284 = vsyncadd [#allocation6], 4294967040 }
  0x12   :  { %1285 = dma.done.wait [#allocation9], 512  }
  0x13   :  { %1286 = vsyncadd [#allocation9], 4294966784  ;;  %v1295_v0 = vmov 0   ;;  %v1353_v1 = vld [vmem:[#allocation2 + $0x40] sm:$0xff]  ;;  %v1355_v2 = vld [vmem:[#allocation2 + $0x48] sm:$0xff]  ;;  %vm154_vm0 = vcmask 130048  }
  0x14   :  { %1160 = vset.pattern.permute.xlu0 %v1295_v0  ;;  %v1357_v3 = vld [vmem:[#allocation2 + $0x50] sm:$0xff]  ;;  %172 = vmatpush.msra.mxu0 %v1353_v1  ;;  %v1361_v4 = vld [vmem:[#allocation2 + $0x58] sm:$0xff]  ;;  %v1363_v5 = vld [vmem:[#allocation2] sm:$0xff]  ;;  %v145_v16 = vmul.f32 %v1353_v1, %v1353_v1  ;;  %v146_v17 = vmul.f32 %v1355_v2, %v1355_v2  ;;  %vm671_vm13 = vcmask 64512   ;;  %s1297_s21 = smov [#allocation10]   ;;  %s1056_s24 = sshll.u32 %s1651_s7, 4  ;;  %s1057_s24 = int_to_ptr.hbm [resolvable:$true] %s1056_s24 }
  0x15   :  { %192 = vmatpush.msra.mxu1 %v1355_v2  ;;  %v1365_v6 = vld [vmem:[#allocation2 + $0x8] sm:$0xff]  ;;  %212 = vmatpush.msra.mxu2 %v1357_v3  ;;  %v1369_v7 = vld [vmem:[#allocation2 + $0x10] sm:$0xff]  ;;  %v1371_v8 = vld [vmem:[#allocation2 + $0x18] sm:$0xff]  ;;  %v147_v20 = vmul.f32 %v1357_v3, %v1357_v3  ;;  %v148_v21 = vmul.f32 %v1361_v4, %v1361_v4  ;;  %v137_v22 = vmul.f32 %v1363_v5, %v1363_v5 }
  0x16   :  { %232 = vmatpush.msra.mxu3 %v1361_v4  ;;  %v153_v9 = vld [vmem:[#allocation7] sm:$0xff]  ;;  %173 = vmatpush.msra.mxu0 %v1363_v5  ;;  %v1377_v10 = vld [vmem:[#allocation2 + $0x60] sm:$0xff]  ;;  %v1383_v12 = vld [vmem:[#allocation2 + $0x70] sm:$0xff]  ;;  %v138_v23 = vmul.f32 %v1365_v6, %v1365_v6  ;;  %v139_v24 = vmul.f32 %v1369_v7, %v1369_v7  ;;  %v140_v25 = vmul.f32 %v1371_v8, %v1371_v8 }
  0x17   :  { %193 = vmatpush.msra.mxu1 %v1365_v6  ;;  %213 = vmatpush.msra.mxu2 %v1369_v7  ;;  %v1379_v11 = vld [vmem:[#allocation2 + $0x68] sm:$0xff]  ;;  %v1385_v13 = vld [vmem:[#allocation2 + $0x78] sm:$0xff]  ;;  %v1389_v14 = vld [vmem:[#allocation2 + $0x20] sm:$0xff]  ;;  %v149_v26 = vmul.f32 %v1377_v10, %v1377_v10  ;;  %v151_v28 = vmul.f32 %v1383_v12, %v1383_v12 }
  0x18   :  { %233 = vmatpush.msra.mxu3 %v1371_v8  ;;  %1071 = vmatmul.msk.f32.vlgmr.msra.gmra.mxu0 %vm154_vm0, %v153_v9  ;;  %v1391_v15 = vld [vmem:[#allocation2 + $0x28] sm:$0xff]  ;;  %v1399_v18 = vld [vmem:[#allocation2 + $0x30] sm:$0xff]  ;;  %v1401_v19 = vld [vmem:[#allocation2 + $0x38] sm:$0xff]  ;;  %v150_v27 = vmul.f32 %v1379_v11, %v1379_v11  ;;  %v152_v29 = vmul.f32 %v1385_v13, %v1385_v13  ;;  %v141_v30 = vmul.f32 %v1389_v14, %v1389_v14 }
  0x19   :  { %1072 = vmatmul.msk.f32.vlgmr.msra.gmra.mxu1 %vm154_vm0, %v153_v9  ;;  %1073 = vmatmul.msk.f32.vlgmr.msra.gmra.mxu2 %vm154_vm0, %v153_v9  ;;  %v142_v31 = vmul.f32 %v1391_v15, %v1391_v15  ;;  %v143_v32 = vmul.f32 %v1399_v18, %v1399_v18  ;;  %v144_v33 = vmul.f32 %v1401_v19, %v1401_v19  ;;  %v136_v34 = vld [vmem:[#allocation5] sm:$0xff]  ;;  %v100_v43 = vld [vmem:[#allocation8] sm:$0xff]  ;;  %v101_v54 = vld [vmem:[#allocation8 + $0x8] sm:$0xff] }
  0x1a   :  { %1074 = vmatmul.msk.f32.vlgmr.msra.gmra.mxu3 %vm154_vm0, %v153_v9  ;;  %252 = vmatpush.msrb.mxu0 %v1377_v10  ;;  %v481_v35 = vld [vmem:[%s1647_s3] sm:$0xff]  ;;  %v104_v50 = vunpack.c.l.bf16 %v100_v43  ;;  %v105_v51 = vunpack.c.h.bf16 %v100_v43  ;;  %v106_v58 = vunpack.c.l.bf16 %v101_v54  ;;  %v107_v62 = vunpack.c.h.bf16 %v101_v54 }
  0x1b   :  { %272 = vmatpush.msrb.mxu1 %v1379_v11  ;;  %292 = vmatpush.msrb.mxu2 %v1383_v12  ;;  %v102_v55 = vld [vmem:[#allocation8 + $0x10] sm:$0xff] }
  0x1c   :  { %312 = vmatpush.msrb.mxu3 %v1385_v13  ;;  %253 = vmatpush.msrb.mxu0 %v1389_v14  ;;  %v108_v0 = vunpack.c.l.bf16 %v102_v55 }
  0x1d   :  { %273 = vmatpush.msrb.mxu1 %v1391_v15  ;;  %293 = vmatpush.msrb.mxu2 %v1399_v18 }
  0x1e   :  { %313 = vmatpush.msrb.mxu3 %v1401_v19  ;;  %335 = vmatpush.msra.mxu0 %v145_v16  ;;  %v551_v16 = vlaneseq }
  0x1f   :  { %355 = vmatpush.msra.mxu1 %v146_v17  ;;  %375 = vmatpush.msra.mxu2 %v147_v20 }
  0x20   :  { %395 = vmatpush.msra.mxu3 %v148_v21  ;;  %1075 = vmatmul.msk.f32.vlgmr.msrb.gmra.mxu0 %vm154_vm0, %v153_v9  ;;  %v109_v21 = vunpack.c.h.bf16 %v102_v55 }
  0x21   :  { %1076 = vmatmul.msk.f32.vlgmr.msrb.gmra.mxu1 %vm154_vm0, %v153_v9  ;;  %1077 = vmatmul.msk.f32.vlgmr.msrb.gmra.mxu2 %vm154_vm0, %v153_v9 }
  0x22   :  { %1078 = vmatmul.msk.f32.vlgmr.msrb.gmra.mxu3 %vm154_vm0, %v153_v9  ;;  %336 = vmatpush.msra.mxu0 %v137_v22 }
  0x23   :  { %356 = vmatpush.msra.mxu1 %v138_v23  ;;  %376 = vmatpush.msra.mxu2 %v139_v24 }
  0x24   :  { %396 = vmatpush.msra.mxu3 %v140_v25  ;;  %415 = vmatpush.msrb.mxu0 %v149_v26  ;;  %v103_v25 = vld [vmem:[#allocation8 + $0x18] sm:$0xff] }
  0x25   :  { %435 = vmatpush.msrb.mxu1 %v150_v27  ;;  %455 = vmatpush.msrb.mxu2 %v151_v28 }
  0x26   :  { %475 = vmatpush.msrb.mxu3 %v152_v29  ;;  %416 = vmatpush.msrb.mxu0 %v141_v30 }
  0x27   :  { %436 = vmatpush.msrb.mxu1 %v142_v31  ;;  %456 = vmatpush.msrb.mxu2 %v143_v32 }
  0x28   :  { %476 = vmatpush.msrb.mxu3 %v144_v33  ;;  %1079 = vmatmul.msk.f32.vlgmr.msra.gmra.mxu0 %vm154_vm0, %v136_v34 }
  0x29   :  { %1080 = vmatmul.msk.f32.vlgmr.msra.gmra.mxu1 %vm154_vm0, %v136_v34  ;;  %1081 = vmatmul.msk.f32.vlgmr.msra.gmra.mxu2 %vm154_vm0, %v136_v34 }
  0x2a   :  { %1082 = vmatmul.msk.f32.vlgmr.msra.gmra.mxu3 %vm154_vm0, %v136_v34  ;;  %484 = vperm.xlu0 %1160, %v481_v35   ;;  %v1468_v35 = vshrl.u32 %v551_v16, 7 }
  0x30   :  { %1083 = vmatmul.msk.f32.vlgmr.msrb.gmra.mxu0 %vm154_vm0, %v136_v34 }
  0x31   :  { %1084 = vmatmul.msk.f32.vlgmr.msrb.gmra.mxu1 %vm154_vm0, %v136_v34  ;;  %1085 = vmatmul.msk.f32.vlgmr.msrb.gmra.mxu2 %vm154_vm0, %v136_v34 }
  0x32   :  { %1086 = vmatmul.msk.f32.vlgmr.msrb.gmra.mxu3 %vm154_vm0, %v136_v34 }
  0x95   :  { %v175_v36 = vpop.f32.mrf.mxu0 }
  0x96   :  { %v195_v37 = vpop.f32.mrf.mxu1 }
  0x9c   :  { %v215_v38 = vpop.f32.mrf.mxu2  ;;  %v1452_v42 = vpop.permute.xlu0 %484 }
  0x9d   :  { %v235_v39 = vpop.f32.mrf.mxu3  ;;  %v255_v40 = vpop.f32.mrf.mxu0 }
  0x9e   :  { %v275_v41 = vpop.f32.mrf.mxu1 }
  0xa4   :  { %v295_v44 = vpop.f32.mrf.mxu2 }
  0xa5   :  { %v315_v45 = vpop.f32.mrf.mxu3  ;;  %v338_v46 = vpop.f32.mrf.mxu0 }
  0xa6   :  { %v358_v47 = vpop.f32.mrf.mxu1  ;;  %v339_v48 = vadd.f32 %v338_v46, %v175_v36 }
  0xa7   :  { %v359_v49 = vadd.f32 %v358_v47, %v195_v37  ;;  %v110_v37 = vunpack.c.l.bf16 %v103_v25  ;;  %v111_v47 = vunpack.c.h.bf16 %v103_v25 }
  0xa8   :  { %v487_v52 = vadd.f32 %v1452_v42, %v339_v48 }
  0xa9   :  { %v488_v53 = vadd.f32 %v1452_v42, %v359_v49 }
  0xaa   :  { %v1456_v56 = vadd.f32 %v487_v52, %v104_v50 }
  0xab   :  { %v1458_v57 = vadd.f32 %v488_v53, %v105_v51 }
  0xac   :  { %v503_v59 = vrot.slane %v1456_v56, 4  ;;  %v378_v61 = vpop.f32.mrf.mxu2 }
  0xad   :  { %v509_v60 = vrot.slane %v1458_v57, 4  ;;  %v398_v63 = vpop.f32.mrf.mxu3  ;;  %v379_v9 = vadd.f32 %v378_v61, %v215_v38  ;;  %v418_v20 = vpop.f32.mrf.mxu0 }
  0xae   :  { %v399_v17 = vadd.f32 %v398_v63, %v235_v39  ;;  %v438_v22 = vpop.f32.mrf.mxu1  ;;  %v419_v23 = vadd.f32 %v418_v20, %v255_v40  ;;  %v504_v26 = vmax.f32 %v1456_v56, %v503_v59 }
  0xaf   :  { %v439_v24 = vadd.f32 %v438_v22, %v275_v41  ;;  %v510_v27 = vmax.f32 %v1458_v57, %v509_v60  ;;  %v489_v28 = vadd.f32 %v1452_v42, %v379_v9 }
  0xb0   :  { %v490_v29 = vadd.f32 %v1452_v42, %v399_v17  ;;  %v491_v30 = vadd.f32 %v1452_v42, %v419_v23  ;;  %v505_v32 = vrot.slane %v504_v26, 2 }
  0xb1   :  { %v492_v31 = vadd.f32 %v1452_v42, %v439_v24  ;;  %v511_v33 = vrot.slane %v510_v27, 2  ;;  %v497_v34 = vadd.f32 %v489_v28, %v106_v58 }
  0xb2   :  { %v498_v36 = vadd.f32 %v490_v29, %v107_v62  ;;  %v1470_v38 = vadd.f32 %v491_v30, %v108_v0  ;;  %v506_v40 = vmax.f32 %v504_v26, %v505_v32 }
  0xb3   :  { %v1472_v39 = vadd.f32 %v492_v31, %v109_v21  ;;  %v512_v41 = vmax.f32 %v510_v27, %v511_v33  ;;  %v515_v43 = vrot.slane %v497_v34, 4 }
  0xb4   :  { %v521_v46 = vrot.slane %v498_v36, 4  ;;  %v527_v48 = vrot.slane %v1470_v38, 4  ;;  %v458_v50 = vpop.f32.mrf.mxu2  ;;  %v507_v52 = vrot.slane %v506_v40, 1 }
  0xb5   :  { %v533_v49 = vrot.slane %v1472_v39, 4  ;;  %v478_v51 = vpop.f32.mrf.mxu3  ;;  %v513_v53 = vrot.slane %v512_v41, 1  ;;  %v516_v54 = vmax.f32 %v497_v34, %v515_v43  ;;  %v459_v58 = vadd.f32 %v458_v50, %v295_v44 }
  0xb6   :  { %v522_v55 = vmax.f32 %v498_v36, %v521_v46  ;;  %v479_v59 = vadd.f32 %v478_v51, %v315_v45  ;;  %v528_v60 = vmax.f32 %v1470_v38, %v527_v48  ;;  %v508_v62 = vmax.f32 %v506_v40, %v507_v52 }
  0xb7   :  { %v534_v61 = vmax.f32 %v1472_v39, %v533_v49  ;;  %v514_v63 = vmax.f32 %v512_v41, %v513_v53  ;;  %v517_v0 = vrot.slane %v516_v54, 2  ;;  %v493_v16 = vadd.f32 %v1452_v42, %v459_v58 }
  0xb8   :  { %v523_v9 = vrot.slane %v522_v55, 2  ;;  %v494_v17 = vadd.f32 %v1452_v42, %v479_v59  ;;  %v529_v20 = vrot.slane %v528_v60, 2  ;;  %vm553_vm1 = vcmp.eq.f32.partialorder %v1456_v56, %v508_v62 }
  0xb9   :  { %v535_v21 = vrot.slane %v534_v61, 2  ;;  %vm554_vm2 = vcmp.eq.f32.partialorder %v1458_v57, %v514_v63  ;;  %v518_v44 = vmax.f32 %v516_v54, %v517_v0  ;;  %v1482_v22 = vadd.f32 %v493_v16, %v110_v37 }
  0xba   :  { %v524_v45 = vmax.f32 %v522_v55, %v523_v9  ;;  %v1484_v23 = vadd.f32 %v494_v17, %v111_v47  ;;  %v530_v24 = vmax.f32 %v528_v60, %v529_v20  ;;  %v561_v26 = vsel %vm553_vm1, %v1468_v35, 8 }
  0xbb   :  { %v536_v25 = vmax.f32 %v534_v61, %v535_v21  ;;  %v562_v27 = vsel %vm554_vm2, %v1468_v35, 8  ;;  %v519_v28 = vrot.slane %v518_v44, 1  ;;  %v539_v29 = vrot.slane %v1482_v22, 4 }
  0xbc   :  { %v525_v42 = vrot.slane %v524_v45, 1  ;;  %v545_v56 = vrot.slane %v1484_v23, 4  ;;  %v531_v30 = vrot.slane %v530_v24, 1  ;;  %v569_v31 = vrot.slane %v561_v26, 4 }
  0xbd   :  { %v537_v57 = vrot.slane %v536_v25, 1  ;;  %v578_v32 = vrot.slane %v562_v27, 4  ;;  %v520_v33 = vmax.f32 %v518_v44, %v519_v28  ;;  %v540_v40 = vmax.f32 %v1482_v22, %v539_v29 }
  0xbe   :  { %v526_v37 = vmax.f32 %v524_v45, %v525_v42  ;;  %v546_v41 = vmax.f32 %v1484_v23, %v545_v56  ;;  %v532_v43 = vmax.f32 %v530_v24, %v531_v30  ;;  %vm1492_vm3 = vcmp.lt.s32.totalorder %v561_v26, %v569_v31 }
  0xbf   :  { %v538_v46 = vmax.f32 %v536_v25, %v537_v57  ;;  %vm1496_vm4 = vcmp.lt.s32.totalorder %v562_v27, %v578_v32  ;;  %vm555_vm5 = vcmp.eq.f32.partialorder %v497_v34, %v520_v33  ;;  %v541_v49 = vrot.slane %v540_v40, 2 }
  0xc0   :  { %vm556_vm6 = vcmp.eq.f32.partialorder %v498_v36, %v526_v37  ;;  %v547_v50 = vrot.slane %v546_v41, 2  ;;  %v563_v51 = vsel %vm555_vm5, %v1468_v35, 8  ;;  %vm557_vm7 = vcmp.eq.f32.partialorder %v1470_v38, %v532_v43 }
  0xc1   :  { %v564_v52 = vsel %vm556_vm6, %v1468_v35, 8  ;;  %vm558_vm8 = vcmp.eq.f32.partialorder %v1472_v39, %v538_v46  ;;  %v587_v53 = vrot.slane %v563_v51, 4  ;;  %v565_v55 = vsel %vm557_vm7, %v1468_v35, 8 }
  0xc2   :  { %v596_v54 = vrot.slane %v564_v52, 4  ;;  %v566_v58 = vsel %vm558_vm8, %v1468_v35, 8  ;;  %v605_v59 = vrot.slane %v565_v55, 4  ;;  %v542_v34 = vmax.f32 %v540_v40, %v541_v49 }
  0xc3   :  { %v614_v60 = vrot.slane %v566_v58, 4  ;;  %v548_v36 = vmax.f32 %v546_v41, %v547_v50  ;;  %vm588_vm9 = vcmp.lt.s32.totalorder %v563_v51, %v587_v53  ;;  %v571_v61 = vsel %vm1492_vm3, %v561_v26, %v569_v31 }
  0xc4   :  { %vm597_vm10 = vcmp.lt.s32.totalorder %v564_v52, %v596_v54  ;;  %v580_v38 = vsel %vm1496_vm4, %v562_v27, %v578_v32  ;;  %vm606_vm11 = vcmp.lt.s32.totalorder %v565_v55, %v605_v59  ;;  %v543_v39 = vrot.slane %v542_v34, 1  ;;  %v1517_v32 = vld [vmem:[%s1648_s4] sm:$0xff] }
  0xc5   :  { %vm615_vm12 = vcmp.lt.s32.totalorder %v566_v58, %v614_v60  ;;  %v549_v62 = vrot.slane %v548_v36, 1  ;;  %v572_v63 = vrot.slane %v571_v61, 2  ;;  %v581_v0 = vrot.slane %v580_v38, 2 }
  0xc6   :  { %v589_v9 = vsel %vm588_vm9, %v563_v51, %v587_v53  ;;  %v598_v16 = vsel %vm597_vm10, %v564_v52, %v596_v54  ;;  %v544_v17 = vmax.f32 %v542_v34, %v543_v39  ;;  %v607_v45 = vsel %vm606_vm11, %v565_v55, %v605_v59 }
  0xc7   :  { %v550_v20 = vmax.f32 %v548_v36, %v549_v62  ;;  %v590_v21 = vrot.slane %v589_v9, 2  ;;  %v599_v44 = vrot.slane %v598_v16, 2  ;;  %vm573_vm14 = vcmp.lt.s32.totalorder %v571_v61, %v572_v63 }
  0xc8   :  { %vm582_vm15 = vcmp.lt.s32.totalorder %v580_v38, %v581_v0  ;;  %v616_v24 = vsel %vm615_vm12, %v566_v58, %v614_v60  ;;  %vm559_vm0 = vcmp.eq.f32.partialorder %v1482_v22, %v544_v17  ;;  %v574_v25 = vsel %vm573_vm14, %v571_v61, %v572_v63  ;;  %v667_v63 = vld [vmem:[%s1648_s4 + $0x10] sm:$0xff] }
  0xc9   :  { %vm560_vm1 = vcmp.eq.f32.partialorder %v1484_v23, %v550_v20  ;;  %v583_v26 = vsel %vm582_vm15, %v580_v38, %v581_v0  ;;  %v567_v27 = vsel %vm559_vm0, %v1468_v35, 8  ;;  %v575_v42 = vrot.slane %v574_v25, 1  ;;  %v666_v38 = vld [vmem:[%s1648_s4 + $0x8] sm:$0xff]  ;;  %v669_v0 = vld [vmem:[%s1648_s4 + $0x20] sm:$0xff] }
  0xca   :  { %v568_v28 = vsel %vm560_vm1, %v1468_v35, 8  ;;  %v584_v29 = vrot.slane %v583_v26, 1  ;;  %v623_v56 = vrot.slane %v567_v27, 4  ;;  %vm591_vm2 = vcmp.lt.s32.totalorder %v589_v9, %v590_v21 }
  0xcb   :  { %v632_v30 = vrot.slane %v568_v28, 4  ;;  %vm600_vm3 = vcmp.lt.s32.totalorder %v598_v16, %v599_v44  ;;  %vm576_vm4 = vcmp.lt.s32.totalorder %v574_v25, %v575_v42  ;;  %v592_v57 = vsel %vm591_vm2, %v589_v9, %v590_v21  ;;  %v670_v9 = vld [vmem:[%s1648_s4 + $0x28] sm:$0xff] }
  0xcc   :  { %vm585_vm5 = vcmp.lt.s32.totalorder %v583_v26, %v584_v29  ;;  %v601_v31 = vsel %vm600_vm3, %v598_v16, %v599_v44  ;;  %vm624_vm6 = vcmp.lt.s32.totalorder %v567_v27, %v623_v56  ;;  %v577_v22 = vsel %vm576_vm4, %v574_v25, %v575_v42 }
  0xcd   :  { %vm633_vm7 = vcmp.lt.s32.totalorder %v568_v28, %v632_v30  ;;  %v586_v23 = vsel %vm585_vm5, %v583_v26, %v584_v29  ;;  %vm641_vm8 = vcmp.eq.s32.totalorder %v1468_v35, %v577_v22  ;;  %v593_v33 = vrot.slane %v592_v57, 1 }
  0xce   :  { %vm642_vm9 = vcmp.eq.s32.totalorder %v1468_v35, %v586_v23  ;;  %v602_v37 = vrot.slane %v601_v31, 1  ;;  %v1296_v40 = vmov 1.0   ;;  %v608_v41 = vrot.slane %v607_v45, 2 }
  0xcf   :  { %1095 = vmatpush.msk.msra.mxu0 %vm641_vm8, %v1296_v40  ;;  %1102 = vmatpush.msk.msra.mxu1 %vm642_vm9, %v1296_v40  ;;  %v617_v43 = vrot.slane %v616_v24, 2  ;;  %v625_v46 = vsel %vm624_vm6, %v567_v27, %v623_v56  ;;  %v634_v47 = vsel %vm633_vm7, %v568_v28, %v632_v30  ;;  %vm594_vm10 = vcmp.lt.s32.totalorder %v592_v57, %v593_v33  ;;  %v112_v30 = vld [vmem:[%s1650_s6] sm:$0xff] }
  0xd0   :  { %1096 = vmatmul.msk.f32.vlgmr.msra.gmra.mxu0 %vm671_vm13, %v1517_v32  ;;  %1103 = vmatmul.msk.f32.vlgmr.msra.gmra.mxu1 %vm671_vm13, %v1517_v32  ;;  %vm603_vm11 = vcmp.lt.s32.totalorder %v601_v31, %v602_v37  ;;  %v626_v48 = vrot.slane %v625_v46, 2  ;;  %v635_v49 = vrot.slane %v634_v47, 2  ;;  %v595_v50 = vsel %vm594_vm10, %v592_v57, %v593_v33 }
  0xd1   :  { %v604_v51 = vsel %vm603_vm11, %v601_v31, %v602_v37  ;;  %vm609_vm12 = vcmp.lt.s32.totalorder %v607_v45, %v608_v41  ;;  %vm618_vm14 = vcmp.lt.s32.totalorder %v616_v24, %v617_v43  ;;  %vm643_vm15 = vcmp.eq.s32.totalorder %v1468_v35, %v595_v50 }
  0xd2   :  { %vm644_vm0 = vcmp.eq.s32.totalorder %v1468_v35, %v604_v51  ;;  %v610_v52 = vsel %vm609_vm12, %v607_v45, %v608_v41  ;;  %v619_v53 = vsel %vm618_vm14, %v616_v24, %v617_v43  ;;  %1109 = vmatpush.msk.msra.mxu2 %vm643_vm15, %v1296_v40  ;;  %vm627_vm1 = vcmp.lt.s32.totalorder %v625_v46, %v626_v48 }
  0xd3   :  { %1116 = vmatpush.msk.msra.mxu3 %vm644_vm0, %v1296_v40  ;;  %v611_v54 = vrot.slane %v610_v52, 1  ;;  %v620_v55 = vrot.slane %v619_v53, 1  ;;  %vm636_vm2 = vcmp.lt.s32.totalorder %v634_v47, %v635_v49  ;;  %1110 = vmatmul.msk.f32.vlgmr.msra.gmra.mxu2 %vm671_vm13, %v1517_v32  ;;  %v628_v58 = vsel %vm627_vm1, %v625_v46, %v626_v48  ;;  %v116_v48 = vld [vmem:[%s1650_s6 + $0x20] sm:$0xff] }
  0xd4   :  { %1117 = vmatmul.msk.f32.vlgmr.msra.gmra.mxu3 %vm671_vm13, %v1517_v32  ;;  %v637_v59 = vsel %vm636_vm2, %v634_v47, %v635_v49  ;;  %v629_v60 = vrot.slane %v628_v58, 1  ;;  %v120_v57 = vunpack.c.l.bf16 %v112_v30  ;;  %v121_v31 = vunpack.c.h.bf16 %v112_v30 }
  0xd5   :  { %vm612_vm3 = vcmp.lt.s32.totalorder %v610_v52, %v611_v54  ;;  %vm621_vm4 = vcmp.lt.s32.totalorder %v619_v53, %v620_v55  ;;  %v638_v34 = vrot.slane %v637_v59, 1  ;;  %v129_v51 = vunpack.c.h.bf16 %v116_v48 }
  0xd6   :  { %v613_v36 = vsel %vm612_vm3, %v610_v52, %v611_v54  ;;  %v622_v61 = vsel %vm621_vm4, %v619_v53, %v620_v55  ;;  %vm630_vm7 = vcmp.lt.s32.totalorder %v628_v58, %v629_v60 }
  0xd7   :  { %vm645_vm5 = vcmp.eq.s32.totalorder %v1468_v35, %v613_v36  ;;  %vm646_vm6 = vcmp.eq.s32.totalorder %v1468_v35, %v622_v61  ;;  %vm639_vm8 = vcmp.lt.s32.totalorder %v637_v59, %v638_v34  ;;  %v631_v39 = vsel %vm630_vm7, %v628_v58, %v629_v60 }
  0xd8   :  { %1123 = vmatpush.msk.msrb.mxu0 %vm645_vm5, %v1296_v40  ;;  %1130 = vmatpush.msk.msrb.mxu1 %vm646_vm6, %v1296_v40  ;;  %v640_v62 = vsel %vm639_vm8, %v637_v59, %v638_v34  ;;  %vm647_vm9 = vcmp.eq.s32.totalorder %v1468_v35, %v631_v39 }
  0xd9   :  { %1097 = vmatmul.msk.f32.gmra.mxu0 %vm671_vm13, %v666_v38  ;;  %1104 = vmatmul.msk.f32.gmra.mxu1 %vm671_vm13, %v666_v38  ;;  %vm648_vm10 = vcmp.eq.s32.totalorder %v1468_v35, %v640_v62  ;;  %v668_v35 = vld [vmem:[%s1648_s4 + $0x18] sm:$0xff] }
  0xda   :  { %1137 = vmatpush.msk.msrb.mxu2 %vm647_vm9, %v1296_v40  ;;  %1144 = vmatpush.msk.msrb.mxu3 %vm648_vm10, %v1296_v40 }
  0xdb   :  { %1111 = vmatmul.msk.f32.gmra.mxu2 %vm671_vm13, %v666_v38 }
  0xdc   :  { %1118 = vmatmul.msk.f32.gmra.mxu3 %vm671_vm13, %v666_v38 }
  0xe1   :  { %1098 = vmatmul.msk.f32.gmra.mxu0 %vm671_vm13, %v667_v63  ;;  %1105 = vmatmul.msk.f32.gmra.mxu1 %vm671_vm13, %v667_v63 }
  0xe3   :  { %1112 = vmatmul.msk.f32.gmra.mxu2 %vm671_vm13, %v667_v63 }
  0xe4   :  { %1119 = vmatmul.msk.f32.gmra.mxu3 %vm671_vm13, %v667_v63 }
  0xe9   :  { %1099 = vmatmul.msk.f32.gmra.mxu0 %vm671_vm13, %v668_v35  ;;  %1106 = vmatmul.msk.f32.gmra.mxu1 %vm671_vm13, %v668_v35 }
  0xeb   :  { %1113 = vmatmul.msk.f32.gmra.mxu2 %vm671_vm13, %v668_v35 }
  0xec   :  { %1120 = vmatmul.msk.f32.gmra.mxu3 %vm671_vm13, %v668_v35 }
  0xf1   :  { %1100 = vmatmul.msk.f32.gmra.mxu0 %vm671_vm13, %v669_v0  ;;  %1107 = vmatmul.msk.f32.gmra.mxu1 %vm671_vm13, %v669_v0 }
  0xf3   :  { %1114 = vmatmul.msk.f32.gmra.mxu2 %vm671_vm13, %v669_v0 }
  0xf4   :  { %1121 = vmatmul.msk.f32.gmra.mxu3 %vm671_vm13, %v669_v0 }
  0xf9   :  { %1101 = vmatmul.msk.f32.gmra.mxu0 %vm671_vm13, %v670_v9  ;;  %1108 = vmatmul.msk.f32.gmra.mxu1 %vm671_vm13, %v670_v9 }
  0xfb   :  { %1115 = vmatmul.msk.f32.gmra.mxu2 %vm671_vm13, %v670_v9 }
  0xfc   :  { %1122 = vmatmul.msk.f32.gmra.mxu3 %vm671_vm13, %v670_v9 }
 0x101   :  { %1124 = vmatmul.msk.f32.vlgmr.msrb.gmra.mxu0 %vm671_vm13, %v1517_v32  ;;  %1131 = vmatmul.msk.f32.vlgmr.msrb.gmra.mxu1 %vm671_vm13, %v1517_v32 }
 0x103   :  { %1138 = vmatmul.msk.f32.vlgmr.msrb.gmra.mxu2 %vm671_vm13, %v1517_v32 }
 0x104   :  { %1145 = vmatmul.msk.f32.vlgmr.msrb.gmra.mxu3 %vm671_vm13, %v1517_v32 }
 0x109   :  { %1125 = vmatmul.msk.f32.gmra.mxu0 %vm671_vm13, %v666_v38  ;;  %1132 = vmatmul.msk.f32.gmra.mxu1 %vm671_vm13, %v666_v38 }
 0x10b   :  { %1139 = vmatmul.msk.f32.gmra.mxu2 %vm671_vm13, %v666_v38 }
 0x10c   :  { %1146 = vmatmul.msk.f32.gmra.mxu3 %vm671_vm13, %v666_v38 }
 0x111   :  { %1126 = vmatmul.msk.f32.gmra.mxu0 %vm671_vm13, %v667_v63  ;;  %1133 = vmatmul.msk.f32.gmra.mxu1 %vm671_vm13, %v667_v63 }
 0x113   :  { %1140 = vmatmul.msk.f32.gmra.mxu2 %vm671_vm13, %v667_v63 }
 0x114   :  { %1147 = vmatmul.msk.f32.gmra.mxu3 %vm671_vm13, %v667_v63 }
 0x119   :  { %1127 = vmatmul.msk.f32.gmra.mxu0 %vm671_vm13, %v668_v35  ;;  %1134 = vmatmul.msk.f32.gmra.mxu1 %vm671_vm13, %v668_v35 }
 0x11b   :  { %1141 = vmatmul.msk.f32.gmra.mxu2 %vm671_vm13, %v668_v35 }
 0x11c   :  { %1148 = vmatmul.msk.f32.gmra.mxu3 %vm671_vm13, %v668_v35 }
 0x121   :  { %1128 = vmatmul.msk.f32.gmra.mxu0 %vm671_vm13, %v669_v0  ;;  %1135 = vmatmul.msk.f32.gmra.mxu1 %vm671_vm13, %v669_v0 }
 0x123   :  { %1142 = vmatmul.msk.f32.gmra.mxu2 %vm671_vm13, %v669_v0 }
 0x124   :  { %1149 = vmatmul.msk.f32.gmra.mxu3 %vm671_vm13, %v669_v0 }
 0x129   :  { %1129 = vmatmul.msk.f32.gmra.mxu0 %vm671_vm13, %v670_v9  ;;  %1136 = vmatmul.msk.f32.gmra.mxu1 %vm671_vm13, %v670_v9 }
 0x12b   :  { %1143 = vmatmul.msk.f32.gmra.mxu2 %vm671_vm13, %v670_v9 }
 0x12c   :  { %1150 = vmatmul.msk.f32.gmra.mxu3 %vm671_vm13, %v670_v9 }
 0x14d   :  { %v707_v16 = vpop.f32.mrf.mxu0  ;;  %v742_v17 = vpop.f32.mrf.mxu1 }
 0x14e   :  { %v970_v22 = vmul.f32 %v707_v16, %v1363_v5  ;;  %v971_v23 = vmul.f32 %v742_v17, %v1365_v6  ;;  %v113_v5 = vld [vmem:[%s1650_s6 + $0x8] sm:$0xff]  ;;  %v128_v6 = vunpack.c.l.bf16 %v116_v48 }
 0x14f   :  { %v122_v52 = vunpack.c.l.bf16 %v113_v5  ;;  %v123_v53 = vunpack.c.h.bf16 %v113_v5 }
 0x156   :  { %v710_v20 = vpop.f32.mrf.mxu0  ;;  %v745_v21 = vpop.f32.mrf.mxu1 }
 0x157   :  { %v777_v44 = vpop.f32.mrf.mxu2  ;;  %v812_v45 = vpop.f32.mrf.mxu3  ;;  %v978_v54 = vmul.f32 %v710_v20, %v1353_v1  ;;  %v979_v55 = vmul.f32 %v745_v21, %v1355_v2  ;;  %v117_v2 = vld [vmem:[%s1650_s6 + $0x28] sm:$0xff] }
 0x158   :  { %v972_v58 = vmul.f32 %v777_v44, %v1369_v7  ;;  %v973_v59 = vmul.f32 %v812_v45, %v1371_v8  ;;  %v130_v20 = vunpack.c.l.bf16 %v117_v2  ;;  %v131_v21 = vunpack.c.h.bf16 %v117_v2 }
 0x15e   :  { %v713_v24 = vpop.f32.mrf.mxu0  ;;  %v748_v25 = vpop.f32.mrf.mxu1 }
 0x15f   :  { %v780_v26 = vpop.f32.mrf.mxu2  ;;  %v815_v27 = vpop.f32.mrf.mxu3  ;;  %v986_v37 = vadd.f32 %v970_v22, %v713_v24  ;;  %v987_v40 = vadd.f32 %v971_v23, %v748_v25 }
 0x160   :  { %v980_v44 = vmul.f32 %v780_v26, %v1357_v3  ;;  %v981_v45 = vmul.f32 %v815_v27, %v1361_v4 }
 0x166   :  { %v716_v28 = vpop.f32.mrf.mxu0  ;;  %v751_v42 = vpop.f32.mrf.mxu1 }
 0x167   :  { %v783_v29 = vpop.f32.mrf.mxu2  ;;  %v818_v56 = vpop.f32.mrf.mxu3  ;;  %v994_v36 = vadd.f32 %v978_v54, %v716_v28  ;;  %v995_v61 = vadd.f32 %v979_v55, %v751_v42 }
 0x168   :  { %v988_v35 = vadd.f32 %v972_v58, %v783_v29  ;;  %v989_v0 = vadd.f32 %v973_v59, %v818_v56 }
 0x16e   :  { %v719_v32 = vpop.f32.mrf.mxu0  ;;  %v754_v33 = vpop.f32.mrf.mxu1 }
 0x16f   :  { %v1002_v41 = vmul.f32 %v719_v32, %v120_v57  ;;  %v1003_v43 = vmul.f32 %v754_v33, %v121_v31  ;;  %v786_v46 = vpop.f32.mrf.mxu2  ;;  %v821_v47 = vpop.f32.mrf.mxu3 }
 0x170   :  { %v996_v29 = vadd.f32 %v980_v44, %v786_v46  ;;  %v997_v56 = vadd.f32 %v981_v45, %v821_v47  ;;  %v114_v46 = vld [vmem:[%s1650_s6 + $0x10] sm:$0xff] }
 0x171   :  { %v1018_v49 = vadd.f32 %v1002_v41, %v986_v37  ;;  %v1019_v50 = vadd.f32 %v1003_v43, %v987_v40  ;;  %v124_v47 = vunpack.c.l.bf16 %v114_v46 }
 0x173   :  { %1034 = vst [vmem:[#allocation10] sm:$0xff] %v1018_v49  ;;  %v125_v49 = vunpack.c.h.bf16 %v114_v46 }
 0x174   :  { %1035 = vst [vmem:[#allocation10 + $0x8] sm:$0xff] %v1019_v50 }
 0x176   :  { %v722_v60 = vpop.f32.mrf.mxu0  ;;  %v757_v34 = vpop.f32.mrf.mxu1 }
 0x177   :  { %v1010_v38 = vmul.f32 %v722_v60, %v128_v6  ;;  %v1011_v39 = vmul.f32 %v757_v34, %v129_v51  ;;  %v789_v62 = vpop.f32.mrf.mxu2  ;;  %v824_v63 = vpop.f32.mrf.mxu3  ;;  %v118_v60 = vld [vmem:[%s1650_s6 + $0x30] sm:$0xff] }
 0x178   :  { %v1004_v9 = vmul.f32 %v789_v62, %v122_v52  ;;  %v1005_v16 = vmul.f32 %v824_v63, %v123_v53 }
 0x179   :  { %v1026_v17 = vadd.f32 %v1010_v38, %v994_v36  ;;  %v1027_v1 = vadd.f32 %v1011_v39, %v995_v61  ;;  %v133_v61 = vunpack.c.h.bf16 %v118_v60 }
 0x17a   :  { %v1020_v7 = vadd.f32 %v1004_v9, %v988_v35  ;;  %v1021_v8 = vadd.f32 %v1005_v16, %v989_v0 }
 0x17b   :  { %1042 = vst [vmem:[#allocation10 + $0x40] sm:$0xff] %v1026_v17 }
 0x17c   :  { %1043 = vst [vmem:[#allocation10 + $0x48] sm:$0xff] %v1027_v1 }
 0x17d   :  { %1036 = vst [vmem:[#allocation10 + $0x10] sm:$0xff] %v1020_v7 }
 0x17e   :  { %1037 = vst [vmem:[#allocation10 + $0x18] sm:$0xff] %v1021_v8  ;;  %v847_v24 = vpop.f32.mrf.mxu0  ;;  %v882_v25 = vpop.f32.mrf.mxu1 }
 0x17f   :  { %v792_v28 = vpop.f32.mrf.mxu2  ;;  %v827_v42 = vpop.f32.mrf.mxu3  ;;  %v974_v50 = vmul.f32 %v847_v24, %v1389_v14  ;;  %v975_v5 = vmul.f32 %v882_v25, %v1391_v15  ;;  %v115_v14 = vld [vmem:[%s1650_s6 + $0x18] sm:$0xff]  ;;  %v132_v15 = vunpack.c.l.bf16 %v118_v60 }
 0x180   :  { %v1012_v30 = vmul.f32 %v792_v28, %v130_v20  ;;  %v1013_v57 = vmul.f32 %v827_v42, %v131_v21  ;;  %v126_v38 = vunpack.c.l.bf16 %v115_v14  ;;  %v127_v39 = vunpack.c.h.bf16 %v115_v14 }
 0x182   :  { %v1028_v31 = vadd.f32 %v1012_v30, %v996_v29  ;;  %v1029_v22 = vadd.f32 %v1013_v57, %v997_v56 }
 0x184   :  { %1044 = vst [vmem:[#allocation10 + $0x50] sm:$0xff] %v1028_v31 }
 0x185   :  { %1045 = vst [vmem:[#allocation10 + $0x58] sm:$0xff] %v1029_v22 }
 0x186   :  { %v850_v23 = vpop.f32.mrf.mxu0  ;;  %v885_v32 = vpop.f32.mrf.mxu1 }
 0x187   :  { %v917_v33 = vpop.f32.mrf.mxu2  ;;  %v952_v37 = vpop.f32.mrf.mxu3  ;;  %v982_v62 = vmul.f32 %v850_v23, %v1377_v10  ;;  %v983_v63 = vmul.f32 %v885_v32, %v1379_v11  ;;  %v119_v11 = vld [vmem:[%s1650_s6 + $0x38] sm:$0xff]  ;;  %s1054_s6 = sshll.u32 %s1297_s21, 4  ;;  %s1055_s6 = int_to_ptr.vmem [resolvable:$true] %s1054_s6 }
 0x188   :  { %v976_v35 = vmul.f32 %v917_v33, %v1399_v18  ;;  %v977_v0 = vmul.f32 %v952_v37, %v1401_v19  ;;  %v134_v28 = vunpack.c.l.bf16 %v119_v11  ;;  %v135_v42 = vunpack.c.h.bf16 %v119_v11 }
 0x18e   :  { %v853_v3 = vpop.f32.mrf.mxu0  ;;  %v888_v26 = vpop.f32.mrf.mxu1 }
 0x18f   :  { %v920_v4 = vpop.f32.mrf.mxu2  ;;  %v955_v27 = vpop.f32.mrf.mxu3  ;;  %v990_v52 = vadd.f32 %v974_v50, %v853_v3  ;;  %v991_v53 = vadd.f32 %v975_v5, %v888_v26 }
 0x190   :  { %v984_v29 = vmul.f32 %v920_v4, %v1383_v12  ;;  %v985_v56 = vmul.f32 %v955_v27, %v1385_v13 }
 0x196   :  { %v856_v40 = vpop.f32.mrf.mxu0  ;;  %v891_v41 = vpop.f32.mrf.mxu1 }
 0x197   :  { %v923_v43 = vpop.f32.mrf.mxu2  ;;  %v958_v48 = vpop.f32.mrf.mxu3  ;;  %v998_v17 = vadd.f32 %v982_v62, %v856_v40  ;;  %v999_v1 = vadd.f32 %v983_v63, %v891_v41 }
 0x198   :  { %v992_v21 = vadd.f32 %v976_v35, %v923_v43  ;;  %v993_v44 = vadd.f32 %v977_v0, %v958_v48 }
 0x19e   :  { %v859_v6 = vpop.f32.mrf.mxu0  ;;  %v894_v51 = vpop.f32.mrf.mxu1 }
 0x19f   :  { %v1006_v54 = vmul.f32 %v859_v6, %v124_v47  ;;  %v1007_v55 = vmul.f32 %v894_v51, %v125_v49  ;;  %v926_v58 = vpop.f32.mrf.mxu2  ;;  %v961_v59 = vpop.f32.mrf.mxu3 }
 0x1a0   :  { %v1000_v31 = vadd.f32 %v984_v29, %v926_v58  ;;  %v1001_v22 = vadd.f32 %v985_v56, %v961_v59 }
 0x1a1   :  { %v1022_v34 = vadd.f32 %v1006_v54, %v990_v52  ;;  %v1023_v36 = vadd.f32 %v1007_v55, %v991_v53 }
 0x1a3   :  { %1038 = vst [vmem:[#allocation10 + $0x20] sm:$0xff] %v1022_v34 }
 0x1a4   :  { %1039 = vst [vmem:[#allocation10 + $0x28] sm:$0xff] %v1023_v36 }
 0x1a6   :  { %v862_v9 = vpop.f32.mrf.mxu0  ;;  %v897_v16 = vpop.f32.mrf.mxu1 }
 0x1a7   :  { %v1014_v2 = vmul.f32 %v862_v9, %v132_v15  ;;  %v1015_v7 = vmul.f32 %v897_v16, %v133_v61  ;;  %v929_v8 = vpop.f32.mrf.mxu2  ;;  %v964_v20 = vpop.f32.mrf.mxu3 }
 0x1a8   :  { %v1008_v45 = vmul.f32 %v929_v8, %v126_v38  ;;  %v1009_v24 = vmul.f32 %v964_v20, %v127_v39 }
 0x1a9   :  { %v1030_v25 = vadd.f32 %v1014_v2, %v998_v17  ;;  %v1031_v10 = vadd.f32 %v1015_v7, %v999_v1 }
 0x1aa   :  { %v1024_v18 = vadd.f32 %v1008_v45, %v992_v21  ;;  %v1025_v19 = vadd.f32 %v1009_v24, %v993_v44 }
 0x1ab   :  { %1046 = vst [vmem:[#allocation10 + $0x60] sm:$0xff] %v1030_v25 }
 0x1ac   :  { %1047 = vst [vmem:[#allocation10 + $0x68] sm:$0xff] %v1031_v10 }
 0x1ad   :  { %1040 = vst [vmem:[#allocation10 + $0x30] sm:$0xff] %v1024_v18 }
 0x1ae   :  { %1041 = vst [vmem:[#allocation10 + $0x38] sm:$0xff] %v1025_v19 }
 0x1af   :  { %v932_v30 = vpop.f32.mrf.mxu2  ;;  %v967_v57 = vpop.f32.mrf.mxu3 }
 0x1b0   :  { %v1016_v23 = vmul.f32 %v932_v30, %v134_v28  ;;  %v1017_v32 = vmul.f32 %v967_v57, %v135_v42 }
 0x1b2   :  { %v1032_v33 = vadd.f32 %v1016_v23, %v1000_v31  ;;  %v1033_v37 = vadd.f32 %v1017_v32, %v1001_v22 }
 0x1b4   :  { %1048 = vst [vmem:[#allocation10 + $0x70] sm:$0xff] %v1032_v33 }
 0x1b5   :  { %1049 = vst [vmem:[#allocation10 + $0x78] sm:$0xff] %v1033_v37 }
 0x1b6   :  { %1062 = dma.vmem_to_hbm [thread:$0]  %s1055_s6, 2048, %s1057_s24, [#allocation4], %s1291_s11, %s1291_s11, %s1292_s12  }
 0x1b7   :  { %1287 = dma.done.wait [#allocation4], 2048  }
 0x1b8   :  { %1288 = vsyncadd [#allocation4], 4294965248 }
 0x1b9   :  { %1067 = vsyncpa [#allocation3], 1 }
 0x1ba   :  { %1068 = vsyncpa [#allocation6], 1 }
 0x1bb   :  { %1069 = vsyncpa [#allocation9], 1 }
 0x1bc   :  { %1070 = vsyncpa [#allocation4], 1 }

</bundles_post_ra>
